<compile_context>
chip_gen: v7x
topology: tpu7x:2x2x1
jax: 0.10.0
libtpu: 0.0.40
codegen_flags: <defaults>
</compile_context>

<pallas_src>
import functools

import jax
import jax.numpy as jnp
from jax.experimental import pallas as pl
from jax.experimental.pallas import tpu as pltpu


def _round_up(x, m):
    return ((x + m - 1) // m) * m


def _re2_fused_kernel(x_ref, m_ref, w_ref, b_ref, o_ref, *, n_layers,
                      kernel_size):
    """All RE2 encoder layers for one batch tile, fully on-chip.

    x_ref : (1, M, C)           flattened batch-tile activations (f32).
                                M = TB * Lp; each element occupies Lp rows,
                                real rows at [pad, pad+L), zero halo elsewhere.
    m_ref : (1, M, 1)           sequence mask, 0 on halo/padded rows (f32).
    w_ref : (n_layers*K, C, C)  per-layer, per-tap conv weights (matmul dtype);
                                w_ref[layer*K + k][i, o] = torch_w[o, i, k].
    b_ref : (n_layers, 1, C)    per-layer conv bias (f32).
    o_ref : (1, M, C)           output of the final layer.
    """
    M, C = x_ref.shape[1], x_ref.shape[2]
    K = kernel_size
    pad = K // 2

    act = x_ref[0]                                  # (M, C) f32, stays on-chip
    # Hoist the mask broadcast out of the unrolled layer loop.
    mask = jnp.broadcast_to(m_ref[0], (M, C))       # (M, C) f32

    for layer in range(n_layers):                   # compile-time constant
        # Mask, then a single (M, C) cast to the matmul dtype per layer.
        xm = (act * mask).astype(w_ref.dtype)
        acc = None
        for k in range(K):
            s = k - pad                             # tap source offset
            # Unshifted matmul; shift the f32 product instead of the packed
            # activation:  out[r] = sum_k (xm @ W_k)[r + s_k].
            p = jnp.dot(xm, w_ref[layer * K + k],
                        preferred_element_type=jnp.float32)   # (M, C) f32
            if s == 0:
                contrib = p
            elif s > 0:
                contrib = jnp.concatenate(
                    [p[s:, :], jnp.zeros((s, C), p.dtype)], axis=0)
            else:
                contrib = jnp.concatenate(
                    [jnp.zeros((-s, C), p.dtype), p[:M + s, :]], axis=0)
            acc = contrib if acc is None else acc + contrib
        act = jnp.maximum(acc + b_ref[layer], 0.0)  # bias + relu in f32

    o_ref[0] = act.astype(o_ref.dtype)


def _choose_batch_tile(B, Lp, C, *, target_rows=256, max_rows=4096):
    """Batch elements per grid step: fill the MXU M dim (>=256 rows for
    v6e/v7x, also >=128 for v5e), keep per-step blocks modest, and keep >= 2
    parallel grid steps when B allows (v7x has 2 TensorCores)."""
    del C
    tb = max(1, -(-target_rows // Lp))          # ceil: TB*Lp >= target_rows
    tb = min(tb, max(1, max_rows // Lp), B)
    if B >= 2 and -(-B // tb) < 2:
        tb = -(-B // 2)
    return max(tb, 1)


def re2_encoder_forward(inputs, mask, params, *, kernel_size,
                        lane_pad=128, matmul_dtype=jnp.bfloat16):
    """Re2Encoder.forward in eval mode (all dropouts are identity).

    inputs : (B, L, E) float, mask : (B, L, 1),
    params : list of (w, b) per layer, PyTorch Conv1d layout
             w : (out_ch, in_ch, K), b : (out_ch,).
    Pass matmul_dtype=jnp.float32 for full-precision matmuls (slower MXU path)
    if bf16 rounding across deep encoders is a concern.
    Returns (B, L, filters_num) in inputs.dtype.
    """
    B, L, E = inputs.shape
    n_layers = len(params)
    K = kernel_size
    assert K % 2 == 1, "padding='same' implemented for odd kernel_size only"
    assert n_layers >= 1
    F = params[-1][1].shape[0]
    pad = K // 2

    # Lane-dense channel width shared by all layers (zero-padded channels).
    C = _round_up(max(E, F), lane_pad)
    # Per-element row stride: real rows at [pad, pad+L), zero halo rows around
    # them so shifted conv taps never read a neighbouring element's rows.
    Lp = _round_up(L + K - 1, 8)

    TB = _choose_batch_tile(B, Lp, C)
    num_tiles = -(-B // TB)
    Bp = num_tiles * TB
    M = TB * Lp

    x_p = jnp.pad(inputs.astype(jnp.float32),
                  ((0, Bp - B), (pad, Lp - L - pad), (0, C - E)))
    m_p = jnp.pad(mask.astype(jnp.float32),
                  ((0, Bp - B), (pad, Lp - L - pad), (0, 0)))
    x_flat = x_p.reshape(num_tiles, M, C)
    m_flat = m_p.reshape(num_tiles, M, 1)

    # Per-layer, per-tap weights: transpose PyTorch (out,in,K) -> (K,in,out),
    # pad channels so every tap matmul is (M, C) @ (C, C).
    w_taps, b_rows = [], []
    for (w, b) in params:
        out_ch, in_ch, k_dim = w.shape
        assert k_dim == K
        w_t = jnp.transpose(w, (2, 1, 0))                       # (K, in, out)
        w_t = jnp.pad(w_t, ((0, 0), (0, C - in_ch), (0, C - out_ch)))
        w_taps.append(w_t)
        b_rows.append(jnp.pad(b, (0, C - out_ch)).reshape(1, C))
    w_stack = jnp.concatenate(w_taps, axis=0).astype(matmul_dtype)  # (nl*K,C,C)
    b_stack = jnp.stack(b_rows).astype(jnp.float32)                 # (nl,1,C)

    kernel = functools.partial(_re2_fused_kernel,
                               n_layers=n_layers, kernel_size=K)

    # Explicit VMEM budget (double-buffered blocks + weights + in-kernel
    # temporaries) with headroom, so the tiles also fit v7x's 64 MiB VMEM.
    blk_bytes = M * C * 4
    need = (2 * (2 * blk_bytes + M * 4
                 + w_stack.size * w_stack.dtype.itemsize
                 + b_stack.size * 4)
            + 8 * blk_bytes)
    vmem_limit = int(min(max(2 * need, 16 << 20), 48 << 20))

    out_flat = pl.pallas_call(
        kernel,
        out_shape=jax.ShapeDtypeStruct((num_tiles, M, C), inputs.dtype),
        grid_spec=pltpu.PrefetchScalarGridSpec(
            num_scalar_prefetch=0,
            grid=(num_tiles,),
            in_specs=[
                pl.BlockSpec((1, M, C), lambda g: (g, 0, 0)),
                pl.BlockSpec((1, M, 1), lambda g: (g, 0, 0)),
                # Grid-invariant weights / bias: constant index_map, DMA'd once.
                # (At realistic widths also consider pipeline_mode=
                #  pl.Buffered(1) to drop the unused second buffer.)
                pl.BlockSpec((n_layers * K, C, C), lambda g: (0, 0, 0)),
                pl.BlockSpec((n_layers, 1, C), lambda g: (0, 0, 0)),
            ],
            out_specs=pl.BlockSpec((1, M, C), lambda g: (g, 0, 0)),
        ),
        compiler_params=pltpu.CompilerParams(
            dimension_semantics=("parallel",),
            vmem_limit_bytes=vmem_limit),
    )(x_flat, m_flat, w_stack, b_stack)

    # Strip batch / halo / channel padding (final dropout is identity in eval).
    out = out_flat.reshape(Bp, Lp, C)[:B, pad:pad + L, :F]
    return out


def _reference_forward(inputs, mask, params, kernel_size):
    """Pure-JAX reference of the module's eval-mode forward (PyTorch Conv1d
    'same' cross-correlation, weight layout (out_ch, in_ch, K))."""
    K = kernel_size
    pad = K // 2
    L = inputs.shape[1]
    out = inputs
    for (w, b) in params:
        xm = out * mask
        xp = jnp.pad(xm, ((0, 0), (pad, K - 1 - pad), (0, 0)))
        acc = sum(jnp.einsum("blc,oc->blo", xp[:, k:k + L, :], w[:, :, k])
                  for k in range(K)) + b
        out = jnp.maximum(acc, 0.0)
    return out


def init_params(key, embedding_size, filters_num, enc_layers, kernel_size):
    """Deterministic synthetic Conv1d params in PyTorch layout:
    w (out_ch, in_ch, K), b (out_ch,)."""
    params = []
    for enc_index in range(enc_layers):
        in_ch = embedding_size if enc_index == 0 else filters_num
        key, kw, kb = jax.random.split(key, 3)
        bound = 1.0 / (in_ch * kernel_size) ** 0.5
        w = jax.random.uniform(kw, (filters_num, in_ch, kernel_size),
                               minval=-bound, maxval=bound, dtype=jnp.float32)
        b = jax.random.uniform(kb, (filters_num,),
                               minval=-bound, maxval=bound, dtype=jnp.float32)
        params.append((w, b))
    return params


if __name__ == "__main__":
    # Small shapes consistent with the module's forward.
    B, L = 4, 8
    embedding_size = 32
    filters_num = 32
    enc_layers = 2
    kernel_size = 3

    key = jax.random.PRNGKey(0)
    key, kx, km = jax.random.split(key, 3)

    inputs = jax.random.normal(kx, (B, L, embedding_size), dtype=jnp.float32)
    # binary sequence mask, shape (B, L, 1), broadcast over channels
    mask = (jax.random.uniform(km, (B, L, 1)) > 0.2).astype(jnp.float32)

    params = init_params(key, embedding_size, filters_num, enc_layers,
                         kernel_size)

    out = re2_encoder_forward(inputs, mask, params, kernel_size=kernel_size)
    out = jax.block_until_ready(out)

    assert out.shape == (B, L, filters_num)
    assert bool(jnp.all(jnp.isfinite(out)))

    # Correctness against the pure-JAX reference (loose tol: bf16 MXU operands).
    ref = _reference_forward(inputs, mask, params, kernel_size)
    assert bool(jnp.allclose(out, ref, rtol=5e-2, atol=5e-2)), \
        f"max abs diff {float(jnp.max(jnp.abs(out - ref)))}"

    print("KERNEL_OK")
</pallas_src>

<mosaic_0001>
module attributes {stable_mosaic.version = 11 : i64} {
  func.func @_re2_fused_kernel(%arg0: i32, %arg1: memref<1x32x128xf32, #tpu.memory_space<vmem>>, %arg2: memref<1x32x1xf32, #tpu.memory_space<vmem>>, %arg3: memref<6x128x128xbf16, #tpu.memory_space<vmem>>, %arg4: memref<2x1x128xf32, #tpu.memory_space<vmem>>, %arg5: memref<1x32x128xf32, #tpu.memory_space<vmem>>) attributes {dimension_semantics = [#tpu.dimension_semantics<parallel>], iteration_bounds = array<i64: 2>, scalar_prefetch = 0 : i64, scratch_operands = 0 : i64, tpu.core_type = #tpu.core_type<tc>, window_params = [{transform_indices = @transform_0, window_bounds = array<i64: 1, 32, 128>}, {transform_indices = @transform_1, window_bounds = array<i64: 1, 32, 1>}, {pipeline_mode = #tpu.pipeline_mode<synchronous>, transform_indices = @transform_2, window_bounds = array<i64: 6, 128, 128>}, {pipeline_mode = #tpu.pipeline_mode<synchronous>, transform_indices = @transform_3, window_bounds = array<i64: 2, 1, 128>}, {transform_indices = @transform_4, window_bounds = array<i64: 1, 32, 128>}]} {
    %c0 = arith.constant 0 : index
    %c0_0 = arith.constant 0 : index
    %c0_1 = arith.constant 0 : index
    %0 = vector.load %arg1[%c0, %c0_0, %c0_1] : memref<1x32x128xf32, #tpu.memory_space<vmem>>, vector<1x32x128xf32>
    %1 = vector.shape_cast %0 : vector<1x32x128xf32> to vector<32x128xf32>
    %c0_2 = arith.constant 0 : index
    %c0_3 = arith.constant 0 : index
    %c0_4 = arith.constant 0 : index
    %2 = vector.load %arg2[%c0_2, %c0_3, %c0_4] : memref<1x32x1xf32, #tpu.memory_space<vmem>>, vector<1x32x1xf32>
    %3 = vector.shape_cast %2 : vector<1x32x1xf32> to vector<32x1xf32>
    %4 = vector.shape_cast %3 : vector<32x1xf32> to vector<32x1xf32>
    %5 = vector.broadcast %4 : vector<32x1xf32> to vector<32x128xf32>
    %6 = arith.mulf %1, %5 : vector<32x128xf32>
    %7 = arith.truncf %6 : vector<32x128xf32> to vector<32x128xbf16>
    %c0_5 = arith.constant 0 : index
    %c0_6 = arith.constant 0 : index
    %c0_7 = arith.constant 0 : index
    %8 = vector.load %arg3[%c0_5, %c0_6, %c0_7] : memref<6x128x128xbf16, #tpu.memory_space<vmem>>, vector<1x128x128xbf16>
    %9 = vector.shape_cast %8 : vector<1x128x128xbf16> to vector<128x128xbf16>
    %cst = arith.constant dense<0.000000e+00> : vector<32x128xf32>
    %10 = tpu.matmul %7, %9, %cst {dimension_numbers = #tpu.dot_dimension_numbers<[1], [0], [0], [1], [0, 0, 1, 1], [], []>} : vector<32x128xbf16>, vector<128x128xbf16>, vector<32x128xf32> -> vector<32x128xf32>
    %cst_8 = arith.constant 0.000000e+00 : f32
    %11 = vector.broadcast %cst_8 : f32 to vector<1x128xf32>
    %12 = vector.extract_strided_slice %10 {offsets = [0, 0], sizes = [31, 128], strides = [1, 1]} : vector<32x128xf32> to vector<31x128xf32>
    %13 = tpu.concatenate %11, %12 in 0 : vector<1x128xf32>, vector<31x128xf32> -> vector<32x128xf32>
    %c1 = arith.constant 1 : index
    %c0_9 = arith.constant 0 : index
    %c0_10 = arith.constant 0 : index
    %14 = vector.load %arg3[%c1, %c0_9, %c0_10] : memref<6x128x128xbf16, #tpu.memory_space<vmem>>, vector<1x128x128xbf16>
    %15 = vector.shape_cast %14 : vector<1x128x128xbf16> to vector<128x128xbf16>
    %cst_11 = arith.constant dense<0.000000e+00> : vector<32x128xf32>
    %16 = tpu.matmul %7, %15, %cst_11 {dimension_numbers = #tpu.dot_dimension_numbers<[1], [0], [0], [1], [0, 0, 1, 1], [], []>} : vector<32x128xbf16>, vector<128x128xbf16>, vector<32x128xf32> -> vector<32x128xf32>
    %17 = arith.addf %13, %16 : vector<32x128xf32>
    %c2 = arith.constant 2 : index
    %c0_12 = arith.constant 0 : index
    %c0_13 = arith.constant 0 : index
    %18 = vector.load %arg3[%c2, %c0_12, %c0_13] : memref<6x128x128xbf16, #tpu.memory_space<vmem>>, vector<1x128x128xbf16>
    %19 = vector.shape_cast %18 : vector<1x128x128xbf16> to vector<128x128xbf16>
    %cst_14 = arith.constant dense<0.000000e+00> : vector<32x128xf32>
    %20 = tpu.matmul %7, %19, %cst_14 {dimension_numbers = #tpu.dot_dimension_numbers<[1], [0], [0], [1], [0, 0, 1, 1], [], []>} : vector<32x128xbf16>, vector<128x128xbf16>, vector<32x128xf32> -> vector<32x128xf32>
    %21 = vector.extract_strided_slice %20 {offsets = [1, 0], sizes = [31, 128], strides = [1, 1]} : vector<32x128xf32> to vector<31x128xf32>
    %cst_15 = arith.constant 0.000000e+00 : f32
    %22 = vector.broadcast %cst_15 : f32 to vector<1x128xf32>
    %23 = tpu.concatenate %21, %22 in 0 : vector<31x128xf32>, vector<1x128xf32> -> vector<32x128xf32>
    %24 = arith.addf %17, %23 : vector<32x128xf32>
    %c0_16 = arith.constant 0 : index
    %c0_17 = arith.constant 0 : index
    %c0_18 = arith.constant 0 : index
    %25 = vector.load %arg4[%c0_16, %c0_17, %c0_18] : memref<2x1x128xf32, #tpu.memory_space<vmem>>, vector<1x1x128xf32>
    %26 = vector.shape_cast %25 : vector<1x1x128xf32> to vector<1x128xf32>
    %27 = vector.broadcast %26 : vector<1x128xf32> to vector<32x128xf32>
    %28 = arith.addf %24, %27 : vector<32x128xf32>
    %cst_19 = arith.constant 0.000000e+00 : f32
    %29 = vector.broadcast %cst_19 : f32 to vector<32x128xf32>
    %30 = arith.maximumf %28, %29 : vector<32x128xf32>
    %31 = arith.mulf %30, %5 : vector<32x128xf32>
    %32 = arith.truncf %31 : vector<32x128xf32> to vector<32x128xbf16>
    %c3 = arith.constant 3 : index
    %c0_20 = arith.constant 0 : index
    %c0_21 = arith.constant 0 : index
    %33 = vector.load %arg3[%c3, %c0_20, %c0_21] : memref<6x128x128xbf16, #tpu.memory_space<vmem>>, vector<1x128x128xbf16>
    %34 = vector.shape_cast %33 : vector<1x128x128xbf16> to vector<128x128xbf16>
    %cst_22 = arith.constant dense<0.000000e+00> : vector<32x128xf32>
    %35 = tpu.matmul %32, %34, %cst_22 {dimension_numbers = #tpu.dot_dimension_numbers<[1], [0], [0], [1], [0, 0, 1, 1], [], []>} : vector<32x128xbf16>, vector<128x128xbf16>, vector<32x128xf32> -> vector<32x128xf32>
    %cst_23 = arith.constant 0.000000e+00 : f32
    %36 = vector.broadcast %cst_23 : f32 to vector<1x128xf32>
    %37 = vector.extract_strided_slice %35 {offsets = [0, 0], sizes = [31, 128], strides = [1, 1]} : vector<32x128xf32> to vector<31x128xf32>
    %38 = tpu.concatenate %36, %37 in 0 : vector<1x128xf32>, vector<31x128xf32> -> vector<32x128xf32>
    %c4 = arith.constant 4 : index
    %c0_24 = arith.constant 0 : index
    %c0_25 = arith.constant 0 : index
    %39 = vector.load %arg3[%c4, %c0_24, %c0_25] : memref<6x128x128xbf16, #tpu.memory_space<vmem>>, vector<1x128x128xbf16>
    %40 = vector.shape_cast %39 : vector<1x128x128xbf16> to vector<128x128xbf16>
    %cst_26 = arith.constant dense<0.000000e+00> : vector<32x128xf32>
    %41 = tpu.matmul %32, %40, %cst_26 {dimension_numbers = #tpu.dot_dimension_numbers<[1], [0], [0], [1], [0, 0, 1, 1], [], []>} : vector<32x128xbf16>, vector<128x128xbf16>, vector<32x128xf32> -> vector<32x128xf32>
    %42 = arith.addf %38, %41 : vector<32x128xf32>
    %c5 = arith.constant 5 : index
    %c0_27 = arith.constant 0 : index
    %c0_28 = arith.constant 0 : index
    %43 = vector.load %arg3[%c5, %c0_27, %c0_28] : memref<6x128x128xbf16, #tpu.memory_space<vmem>>, vector<1x128x128xbf16>
    %44 = vector.shape_cast %43 : vector<1x128x128xbf16> to vector<128x128xbf16>
    %cst_29 = arith.constant dense<0.000000e+00> : vector<32x128xf32>
    %45 = tpu.matmul %32, %44, %cst_29 {dimension_numbers = #tpu.dot_dimension_numbers<[1], [0], [0], [1], [0, 0, 1, 1], [], []>} : vector<32x128xbf16>, vector<128x128xbf16>, vector<32x128xf32> -> vector<32x128xf32>
    %46 = vector.extract_strided_slice %45 {offsets = [1, 0], sizes = [31, 128], strides = [1, 1]} : vector<32x128xf32> to vector<31x128xf32>
    %cst_30 = arith.constant 0.000000e+00 : f32
    %47 = vector.broadcast %cst_30 : f32 to vector<1x128xf32>
    %48 = tpu.concatenate %46, %47 in 0 : vector<31x128xf32>, vector<1x128xf32> -> vector<32x128xf32>
    %49 = arith.addf %42, %48 : vector<32x128xf32>
    %c1_31 = arith.constant 1 : index
    %c0_32 = arith.constant 0 : index
    %c0_33 = arith.constant 0 : index
    %50 = vector.load %arg4[%c1_31, %c0_32, %c0_33] : memref<2x1x128xf32, #tpu.memory_space<vmem>>, vector<1x1x128xf32>
    %51 = vector.shape_cast %50 : vector<1x1x128xf32> to vector<1x128xf32>
    %52 = vector.broadcast %51 : vector<1x128xf32> to vector<32x128xf32>
    %53 = arith.addf %49, %52 : vector<32x128xf32>
    %cst_34 = arith.constant 0.000000e+00 : f32
    %54 = vector.broadcast %cst_34 : f32 to vector<32x128xf32>
    %55 = arith.maximumf %53, %54 : vector<32x128xf32>
    %c0_35 = arith.constant 0 : index
    %c0_36 = arith.constant 0 : index
    %c0_37 = arith.constant 0 : index
    %56 = vector.load %arg5[%c0_35, %c0_36, %c0_37] : memref<1x32x128xf32, #tpu.memory_space<vmem>>, vector<1x32x128xf32>
    %57 = vector.shape_cast %56 : vector<1x32x128xf32> to vector<32x128xf32>
    %58 = vector.shape_cast %55 : vector<32x128xf32> to vector<1x32x128xf32>
    tpu.vector_store %arg5[%c0_35, %c0_36, %c0_37], %58 {strides = array<i32>} : memref<1x32x128xf32, #tpu.memory_space<vmem>>, vector<1x32x128xf32>,
    return
  }
  func.func @transform_0(%arg0: i32) -> (i32, i32, i32) {
    %c0_i32 = arith.constant 0 : i32
    %c0_i32_0 = arith.constant 0 : i32
    %c0_i32_1 = arith.constant 0 : i32
    return %arg0, %c0_i32, %c0_i32_0 : i32, i32, i32
  }
  func.func @transform_1(%arg0: i32) -> (i32, i32, i32) {
    %c0_i32 = arith.constant 0 : i32
    %c0_i32_0 = arith.constant 0 : i32
    %c0_i32_1 = arith.constant 0 : i32
    return %arg0, %c0_i32, %c0_i32_0 : i32, i32, i32
  }
  func.func @transform_2(%arg0: i32) -> (i32, i32, i32) {
    %c0_i32 = arith.constant 0 : i32
    %c0_i32_0 = arith.constant 0 : i32
    %c0_i32_1 = arith.constant 0 : i32
    %c0_i32_2 = arith.constant 0 : i32
    return %c0_i32, %c0_i32_0, %c0_i32_1 : i32, i32, i32
  }
  func.func @transform_3(%arg0: i32) -> (i32, i32, i32) {
    %c0_i32 = arith.constant 0 : i32
    %c0_i32_0 = arith.constant 0 : i32
    %c0_i32_1 = arith.constant 0 : i32
    %c0_i32_2 = arith.constant 0 : i32
    return %c0_i32, %c0_i32_0, %c0_i32_1 : i32, i32, i32
  }
  func.func @transform_4(%arg0: i32) -> (i32, i32, i32) {
    %c0_i32 = arith.constant 0 : i32
    %c0_i32_0 = arith.constant 0 : i32
    %c0_i32_1 = arith.constant 0 : i32
    return %arg0, %c0_i32, %c0_i32_0 : i32, i32, i32
  }
}

</mosaic_0001>

<bundles_post_ra>
// kernel: tpu_custom_call.1
= control target key start
LH: loop header
LB: loop body
LE: loop exit
PB: predicated region body
PF: predicated region fallthrough
CT: control target
= control target key end

     0   :  { %9 = vsyncpa [#allocation3], 0  ;;  %s1845_s0 = inlined_call_operand.vmem [shape: f32[2,32,128], index: 0, kind: input, shape index: {}]   ;;  %s1846_s1 = inlined_call_operand.vmem [shape: f32[2,32,1], index: 1, kind: input, shape index: {}]   ;;  %s1847_s2 = inlined_call_operand.hbm [shape: bf16[6,128,128], index: 2, kind: input, shape index: {}]   ;;  %s1848_s3 = inlined_call_operand.vmem [shape: f32[2,1,128], index: 3, kind: input, shape index: {}]   ;;  %s1849_s4 = inlined_call_operand.hbm [shape: f32[2,32,128], index: 4, kind: output, shape index: {}]  }
   0x1   :  { %10 = vsyncpa [#allocation4], 0 }
   0x2   :  { %12 = vsyncpa [#allocation4 + $0x1], 0  ;;  %s1655_s15 = smov 0   ;;  %s1657_s16 = smov 0  }
   0x3   :  { %s1659_s17 = smov 0   ;;  %s1661_s18 = smov 0  }
   0x4 LB: > { %s1676_s19 = sadd.s32 4294967295, %s1621_s18   ;;  %s1172_s20 = sadd.s32 4294967294, %s1621_s18   ;;  %s1621_s18 = sphi %s1661_s18, %s1865_s18   ;;  %s1617_s17 = sphi %s1659_s17, %s1864_s17   ;;  %s1613_s16 = sphi %s1657_s16, %s1863_s16   ;;  %s1609_s15 = sphi %s1655_s15, %s1862_s15  }
   0x5   : > { %s1680_s21 = sadd.s32 1, %s1621_s18   ;;  %s119_s22 = sadd.s32 1, %s1617_s17 }
   0x6   : > { %s116_s23 = ssub.s32 %s1621_s18, %s1680_s21  ;;  %p129_p0 = scmp.ne.s32.totalorder %s1617_s17, %s1613_s16 }
   0x7   : > { %p117_p1 = scmp.eq.s32.totalorder %s116_s23, 0  ;;  %p130_p2 = scmp.eq.s32.totalorder %s1676_s19, 1 }
   0x8   : > { %p135_p3 = scmp.ne.s32.totalorder %s1613_s16, %s1609_s15  ;;  %p136_p4 = scmp.eq.s32.totalorder %s1172_s20, 1 }
   0x9   : > { %s1691_s24 = scalar_select %p117_p1, %s1617_s17, %s119_s22  }
   0xa   : > { %p1693_p5 = por %p130_p2, %p129_p0  ;;  %p1697_p6 = por %p136_p4, %p135_p3 }
   0xb   : > { %p1173_p7 = scmp.ge.s32.totalorder %s1621_s18, 1  ;;  %p143_p8 = scmp.lt.s32.totalorder %s1621_s18, 3 }
   0xc   : > { %s1853_s25 = scalar_select %p1693_p5, 1, 0 }
   0xd   : > { %s1854_s26 = scalar_select %p1697_p6, 1, 0 }
   0xe   : > { %p1850_p9 = scmp.eq.s32.totalorder %s1676_s19, 0  ;;  %p1704_p10 = pnand %p1173_p7, %p143_p8 }
   0xf   : > { %s1623_s28 = smov [#allocation2]   ;;  %s1527_s7 = scalar_lea.hbm %s1847_s2, 6144 }
  0x10   : > { %s1855_s27 = scalar_select %p1704_p10, 1, 0 }
  0x11   : > { %s155_s29 = sshll.u32 %s1623_s28, 4  ;;  %p1428_p11 = pneg %p1704_p10  ;;  %s156_s29 = int_to_ptr.vmem [resolvable:$true] %s155_s29 }
  0x12   : > { %p1528_p13 = scmp.ne.s32.totalorder %s1847_s2, %s1527_s7  ;;  %p1534_p3 = scmp.lt.u32.totalorder %s1527_s7, %s1847_s2 }
  0x13   : > { %p1712_p12 = pnand %p1850_p9, %p1428_p11 }
  0x15   : > { %p1529_p0 = pneg %p1712_p12 }
  0x17   : > { %p1530_p1 = pnand %p1529_p0, %p1528_p13 }
  0x19   : > { %p1531_p2 = pneg %p1530_p1 }
  0x1b   : > { %p1536_p4 = pnand %p1534_p3, %p1531_p2 }
  0x1d   : > { %1539 = shalt.err (!%p1536_p4)
}
  0x1e   : > { %s1540_s12 = scalar_lea.vmem %s156_s29, 6144  ;;  %p1548_p9 = scmp.lt.s32.totalorder %s156_s29, %s156_s29 }
  0x1f   : > { %p1541_p7 = scmp.ne.s32.totalorder %s156_s29, %s1540_s12  ;;  %p1549_p6 = scmp.lt.s32.totalorder %s1540_s12, %s1540_s12 }
  0x21   : > { %p1543_p8 = pnand %p1541_p7, %p1529_p0  ;;  %p1550_p5 = por %p1549_p6, %p1548_p9 }
  0x23   : > { %p1544_p11 = pneg %p1543_p8 }
  0x25   : > { %p1551_p10 = pnand %p1550_p5, %p1544_p11 }
  0x27   : > { %1554 = shalt.err (!%p1551_p10)
}
  0x28   : > { %s1624_s13 = smov 64   ;;  %s1625_s14 = smov 4  }
  0x29   : > { %1431 = dma.hbm_to_vmem [thread:$0]  (!%p1712_p12), %s1847_s2, 6144, %s156_s29, [#allocation3], %s1624_s13, %s1624_s13, %s1625_s14  }
  0x2a   : > { %p1857_p13 = scmp.ne.s32.totalorder %s1855_s27, 0 }
  0x2b   : > { %p1858_p1 = scmp.eq.s32.totalorder (!%p1857_p13), %s1676_s19, 0 }
  0x2c   : > { %190 = sbr.rel (%p1857_p13) target bundleno = 728 (0x2d8), region = 36 }
  0x33   : > { %1600 = dma.done.wait (%p1858_p1), [#allocation3], 6144   ;;  %p1859_p0 = pmov %p1858_p1 }
  0x34   : > { %p221_p5 = scmp.lt.s32.totalorder %s1676_s19, 1  ;;  %v1626_v0 = vmov 0   ;;  %v1479_v5 = vld [vmem:[#allocation2] sm:$0xff]   ;;  %v1481_v7 = vld [vmem:[#allocation2 + $0x8] sm:$0xff]   ;;  %v1483_v9 = vld [vmem:[#allocation2 + $0x10] sm:$0xff]   ;;  %vm383_vm0 = vcmask 1040384  }
  0x35   : > { %1602 = vsyncadd (%p1859_p0), [#allocation3], 4294961152  ;;  %1478 = vset.pattern.permute.xlu1 %v1626_v0  ;;  %1477 = vset.pattern.permute.xlu0 %v1626_v0  ;;  %v1480_v6 = vld [vmem:[#allocation2 + $0x40] sm:$0xff]   ;;  %v1482_v8 = vld [vmem:[#allocation2 + $0x48] sm:$0xff]   ;;  %vm632_vm1 = vcmask 1046528   ;;  %s218_s10 = sand.u32 1, %s1613_s16  }
  0x36   : > { %s1740_s23 = scalar_select %p221_p5, %s1676_s19, 1  ;;  %1302 = vmatprep.subr.bf16.mxu0 %v1479_v5  ;;  %1322 = vmatprep.subr.bf16.mxu1 %v1480_v6  ;;  %v1484_v10 = vld [vmem:[#allocation2 + $0x50] sm:$0xff]   ;;  %v1485_v11 = vld [vmem:[#allocation2 + $0x18] sm:$0xff]   ;;  %v1487_v13 = vld [vmem:[#allocation2 + $0x20] sm:$0xff]  }
  0x37   : > { %1303 = vmatpush3.bf16.msra.mxu0 %v1479_v5  ;;  %1323 = vmatpush3.bf16.msra.mxu1 %v1480_v6  ;;  %v1486_v12 = vld [vmem:[#allocation2 + $0x58] sm:$0xff]   ;;  %v1488_v14 = vld [vmem:[#allocation2 + $0x60] sm:$0xff]   ;;  %v1489_v15 = vld [vmem:[#allocation2 + $0x28] sm:$0xff]   ;;  %s1178_s11 = sshll.u32 %s218_s10, 5  ;;  %s1241_s22 = sshll.u32 %s1676_s19, 9 }
  0x38   : > { %s1239_s28 = sshll.u32 %s1740_s23, 5  ;;  %1304 = vmatprep.subr.bf16.mxu0 %v1481_v7  ;;  %1324 = vmatprep.subr.bf16.mxu1 %v1482_v8  ;;  %v1490_v16 = vld [vmem:[#allocation2 + $0x68] sm:$0xff]   ;;  %v1491_v17 = vld [vmem:[#allocation2 + $0x30] sm:$0xff]   ;;  %v1493_v19 = vld [vmem:[#allocation2 + $0x38] sm:$0xff]   ;;  %s220_s14 = scalar_lea.vmem [#allocation5], %s1178_s11 }
  0x39   : > { %s230_s30 = scalar_lea.vmem %s1846_s1, %s1239_s28  ;;  %v1492_v18 = vld [vmem:[#allocation2 + $0x70] sm:$0xff]   ;;  %v1494_v20 = vld [vmem:[#allocation2 + $0x78] sm:$0xff]   ;;  %v1495_v21 = vld [vmem:[#allocation2 + $0x80] sm:$0xff]   ;;  %s225_s7 = scalar_lea.vmem %s1845_s0, %s1239_s28 }
  0x3a   : > { %v238_v1 = vld [vmem:[%s230_s30 + $0x10] sm:$0xff]  ;;  %v236_v2 = vld [vmem:[%s230_s30] sm:$0xff]  ;;  %v239_v3 = vld [vmem:[%s230_s30 + $0x18] sm:$0xff]  ;;  %s1086_s20 = sshll.u32 %s220_s14, 4  ;;  %s1800_s27 = scalar_lea.hbm %s1849_s4, %s1241_s22  ;;  %s1795_s20 = int_to_ptr.vmem [resolvable:$true] %s1086_s20 }
  0x3b   : > { %252 = vperm.xlu1 %1478, %v238_v1   ;;  %242 = vperm.xlu0 %1477, %v236_v2   ;;  %v237_v4 = vld [vmem:[%s230_s30 + $0x8] sm:$0xff]  ;;  %v234_v24 = vld [vmem:[%s225_s7 + $0x10] sm:$0xff]  ;;  %v232_v25 = vld [vmem:[%s225_s7] sm:$0xff]  ;;  %s1804_s19 = scalar_lea.sflag [#allocation4], %s218_s10  ;;  %s1555_s29 = scalar_lea.vmem %s1795_s20, 512 }
  0x3c   : > { %1305 = vmatpush3.bf16.msra.mxu0 %v1481_v7  ;;  %1325 = vmatpush3.bf16.msra.mxu1 %v1482_v8  ;;  %v235_v26 = vld [vmem:[%s225_s7 + $0x18] sm:$0xff]  ;;  %v233_v27 = vld [vmem:[%s225_s7 + $0x8] sm:$0xff]  ;;  %v1497_v37 = vld [vmem:[#allocation2 + $0x90] sm:$0xff]   ;;  %p1556_p6 = scmp.ne.s32.totalorder %s1795_s20, %s1555_s29  ;;  %p1860_p9 = scmp.ne.s32.totalorder %s1853_s25, 0 }
  0x3d   : > { %1306 = vmatprep.subr.bf16.mxu0 %v1483_v9  ;;  %1326 = vmatprep.subr.bf16.mxu1 %v1484_v10  ;;  %v1496_v36 = vld [vmem:[#allocation2 + $0x88] sm:$0xff]   ;;  %v1498_v38 = vld [vmem:[#allocation2 + $0x98] sm:$0xff]   ;;  %v1499_v39 = vld [vmem:[#allocation2 + $0xa0] sm:$0xff]   ;;  %s1627_s30 = smov [#allocation5]  }
  0x3e   : > { %v1500_v40 = vld [vmem:[#allocation2 + $0xa8] sm:$0xff]   ;;  %v1501_v41 = vld [vmem:[#allocation2 + $0xb0] sm:$0xff]   ;;  %v1502_v42 = vld [vmem:[#allocation2 + $0xb8] sm:$0xff]   ;;  %p1557_p10 = pnand %p1556_p6, %p1860_p9  ;;  %s1559_s5 = sshll.u32 %s1627_s30, 4  ;;  %s1560_s5 = int_to_ptr.vmem [resolvable:$false] %s1559_s5 }
  0x3f   : > { %257 = vperm.xlu1 %1478, %v239_v3   ;;  %247 = vperm.xlu0 %1477, %v237_v4   ;;  %v1503_v43 = vld [vmem:[#allocation2 + $0xc0] sm:$0xff]   ;;  %v1505_v45 = vld [vmem:[#allocation2 + $0xc8] sm:$0xff]   ;;  %v1507_v47 = vld [vmem:[#allocation2 + $0xd0] sm:$0xff]   ;;  %s1561_s6 = scalar_lea.vmem %s1560_s5, 1024  ;;  %p1562_p2 = scmp.lt.s32.totalorder %s1795_s20, %s1560_s5 }
  0x40   : > { %1307 = vmatpush3.bf16.msra.mxu0 %v1483_v9  ;;  %1327 = vmatpush3.bf16.msra.mxu1 %v1484_v10  ;;  %v1504_v44 = vld [vmem:[#allocation2 + $0x100] sm:$0xff]   ;;  %v1506_v46 = vld [vmem:[#allocation2 + $0x108] sm:$0xff]   ;;  %v1508_v48 = vld [vmem:[#allocation2 + $0x110] sm:$0xff]   ;;  %p1558_p12 = pneg %p1557_p10  ;;  %p1563_p3 = scmp.lt.s32.totalorder %s1561_s6, %s1555_s29 }
  0x41   : > { %1308 = vmatprep.subr.bf16.mxu0 %v1485_v11  ;;  %1328 = vmatprep.subr.bf16.mxu1 %v1486_v12  ;;  %v1509_v49 = vld [vmem:[#allocation2 + $0xd8] sm:$0xff]   ;;  %v1511_v51 = vld [vmem:[#allocation2 + $0xe0] sm:$0xff]   ;;  %v1513_v53 = vld [vmem:[#allocation2 + $0xe8] sm:$0xff]  }
  0x42   : > { %v1510_v50 = vld [vmem:[#allocation2 + $0x118] sm:$0xff]   ;;  %v1512_v52 = vld [vmem:[#allocation2 + $0x120] sm:$0xff]   ;;  %v1514_v54 = vld [vmem:[#allocation2 + $0x128] sm:$0xff]   ;;  %p1564_p4 = por %p1563_p3, %p1562_p2 }
  0x43   : > { %v1515_v55 = vld [vmem:[#allocation2 + $0xf0] sm:$0xff]   ;;  %v1517_v57 = vld [vmem:[#allocation2 + $0xf8] sm:$0xff]   ;;  %v1519_v59 = vld [vmem:[#allocation2 + $0x140] sm:$0xff]  }
  0x44   : > { %1309 = vmatpush3.bf16.msra.mxu0 %v1485_v11  ;;  %1329 = vmatpush3.bf16.msra.mxu1 %v1486_v12  ;;  %v1516_v56 = vld [vmem:[#allocation2 + $0x130] sm:$0xff]   ;;  %v1518_v58 = vld [vmem:[#allocation2 + $0x138] sm:$0xff]   ;;  %p1565_p7 = pnand %p1564_p4, %p1558_p12 }
  0x45   : > { %1310 = vmatprep.subr.bf16.mxu0 %v1487_v13  ;;  %1330 = vmatprep.subr.bf16.mxu1 %v1488_v14 }
  0x48   : > { %1311 = vmatpush3.bf16.msra.mxu0 %v1487_v13  ;;  %1331 = vmatpush3.bf16.msra.mxu1 %v1488_v14 }
  0x49   : > { %1312 = vmatprep.subr.bf16.mxu0 %v1489_v15  ;;  %1332 = vmatprep.subr.bf16.mxu1 %v1490_v16 }
  0x4c   : > { %1313 = vmatpush3.bf16.msra.mxu0 %v1489_v15  ;;  %1333 = vmatpush3.bf16.msra.mxu1 %v1490_v16 }
  0x4d   : > { %1314 = vmatprep.subr.bf16.mxu0 %v1491_v17  ;;  %1334 = vmatprep.subr.bf16.mxu1 %v1492_v18 }
  0x50   : > { %1315 = vmatpush3.bf16.msra.mxu0 %v1491_v17  ;;  %1335 = vmatpush3.bf16.msra.mxu1 %v1492_v18 }
  0x51   : > { %1316 = vmatprep.subr.bf16.mxu0 %v1493_v19  ;;  %1336 = vmatprep.subr.bf16.mxu1 %v1494_v20 }
  0x54   : > { %1317 = vmatpush3.bf16.msra.mxu0 %v1493_v19  ;;  %1337 = vmatpush3.bf16.msra.mxu1 %v1494_v20 }
  0x55   : > { %1342 = vmatprep.subr.bf16.mxu0 %v1495_v21  ;;  %1362 = vmatprep.subr.bf16.mxu1 %v1503_v43 }
  0xba   : > { %v1753_v22 = vpop.permute.xlu1 %252  ;;  %v1755_v23 = vpop.permute.xlu0 %242 }
  0xbb   : > { %v262_v30 = vmul.f32 %v1753_v22, %v234_v24  ;;  %v260_v31 = vmul.f32 %v1755_v23, %v232_v25 }
  0xbe   : > { %v1757_v28 = vpop.permute.xlu1 %257  ;;  %v1759_v29 = vpop.permute.xlu0 %247 }
  0xbf   : > { %v263_v32 = vmul.f32 %v1757_v28, %v235_v26  ;;  %v261_v33 = vmul.f32 %v1759_v29, %v233_v27 }
  0xc1   : > { %v265_v34 = vpack.c.bf16 %v263_v32, %v262_v30  ;;  %v264_v35 = vpack.c.bf16 %v261_v33, %v260_v31  ;;  %v1207_v30 = vld [vmem:[%s1848_s3] ss:$0 sm:$0xff] }
  0xc3   : > { %1318 = vmatprep.mubr.bf16.mxu0 %v264_v35  ;;  %1338 = vmatprep.mubr.bf16.mxu1 %v264_v35 }
  0xc4   : > { %1319 = vmatmul.mubr.bf16.vlgmr.msra.gmra.mrb[0].mxu0 %v265_v34  ;;  %1339 = vmatmul.mubr.bf16.vlgmr.msra.gmra.mrb[0].mxu1 %v265_v34 }
  0xc5   : > { %1343 = vmatpush3.bf16.msra.mxu0 %v1495_v21  ;;  %1358 = vmatprep.mubr.bf16.mxu0 %v264_v35 }
  0xc6   : > { %1344 = vmatprep.subr.bf16.mxu0 %v1496_v36  ;;  %1363 = vmatpush3.bf16.msra.mxu1 %v1503_v43 }
  0xc7   : > { %1364 = vmatprep.subr.bf16.mxu1 %v1505_v45 }
  0xc9   : > { %1345 = vmatpush3.bf16.msra.mxu0 %v1496_v36 }
  0xca   : > { %1346 = vmatprep.subr.bf16.mxu0 %v1497_v37  ;;  %1365 = vmatpush3.bf16.msra.mxu1 %v1505_v45 }
  0xcb   : > { %1366 = vmatprep.subr.bf16.mxu1 %v1507_v47 }
  0xcd   : > { %1347 = vmatpush3.bf16.msra.mxu0 %v1497_v37 }
  0xce   : > { %1348 = vmatprep.subr.bf16.mxu0 %v1498_v38  ;;  %1367 = vmatpush3.bf16.msra.mxu1 %v1507_v47 }
  0xcf   : > { %1368 = vmatprep.subr.bf16.mxu1 %v1509_v49 }
  0xd1   : > { %1349 = vmatpush3.bf16.msra.mxu0 %v1498_v38 }
  0xd2   : > { %1350 = vmatprep.subr.bf16.mxu0 %v1499_v39  ;;  %1369 = vmatpush3.bf16.msra.mxu1 %v1509_v49 }
  0xd3   : > { %1370 = vmatprep.subr.bf16.mxu1 %v1511_v51 }
  0xd5   : > { %1351 = vmatpush3.bf16.msra.mxu0 %v1499_v39 }
  0xd6   : > { %1352 = vmatprep.subr.bf16.mxu0 %v1500_v40  ;;  %1371 = vmatpush3.bf16.msra.mxu1 %v1511_v51  ;;  %v1520_v51 = vld [vmem:[#allocation2 + $0x148] sm:$0xff]  }
  0xd7   : > { %1372 = vmatprep.subr.bf16.mxu1 %v1513_v53 }
  0xd9   : > { %1353 = vmatpush3.bf16.msra.mxu0 %v1500_v40 }
  0xda   : > { %1354 = vmatprep.subr.bf16.mxu0 %v1501_v41  ;;  %1373 = vmatpush3.bf16.msra.mxu1 %v1513_v53  ;;  %v1526_v53 = vld [vmem:[#allocation2 + $0x178] sm:$0xff]  }
  0xdb   : > { %1374 = vmatprep.subr.bf16.mxu1 %v1515_v55 }
  0xdd   : > { %1355 = vmatpush3.bf16.msra.mxu0 %v1501_v41 }
  0xde   : > { %1356 = vmatprep.subr.bf16.mxu0 %v1502_v42  ;;  %1375 = vmatpush3.bf16.msra.mxu1 %v1515_v55 }
  0xdf   : > { %1376 = vmatprep.subr.bf16.mxu1 %v1517_v57 }
  0xe1   : > { %1357 = vmatpush3.bf16.msra.mxu0 %v1502_v42 }
  0xe2   : > { %1382 = vmatprep.subr.bf16.mxu0 %v1504_v44  ;;  %1377 = vmatpush3.bf16.msra.mxu1 %v1517_v57 }
  0xe3   : > { %1402 = vmatprep.subr.bf16.mxu1 %v1519_v59 }
  0xe4   : > { %1359 = vmatmul.mubr.bf16.vlgmr.msra.gmra.mrb[4].mxu0 %v265_v34 }
  0xe5   : > { %1383 = vmatpush3.bf16.msra.mxu0 %v1504_v44 }
  0xe6   : > { %1384 = vmatprep.subr.bf16.mxu0 %v1506_v46 }
  0xe9   : > { %1385 = vmatpush3.bf16.msra.mxu0 %v1506_v46 }
  0xea   : > { %1386 = vmatprep.subr.bf16.mxu0 %v1508_v48 }
  0xed   : > { %1387 = vmatpush3.bf16.msra.mxu0 %v1508_v48 }
  0xee   : > { %1388 = vmatprep.subr.bf16.mxu0 %v1510_v50 }
  0xf1   : > { %1389 = vmatpush3.bf16.msra.mxu0 %v1510_v50 }
  0xf2   : > { %1390 = vmatprep.subr.bf16.mxu0 %v1512_v52 }
  0xf5   : > { %1391 = vmatpush3.bf16.msra.mxu0 %v1512_v52  ;;  %v1521_v52 = vld [vmem:[#allocation2 + $0x150] sm:$0xff]  }
  0xf6   : > { %1392 = vmatprep.subr.bf16.mxu0 %v1514_v54 }
  0xf9   : > { %1393 = vmatpush3.bf16.msra.mxu0 %v1514_v54 }
  0xfa   : > { %1394 = vmatprep.subr.bf16.mxu0 %v1516_v56 }
  0xfd   : > { %1395 = vmatpush3.bf16.msra.mxu0 %v1516_v56 }
  0xfe   : > { %1396 = vmatprep.subr.bf16.mxu0 %v1518_v58 }
 0x101   : > { %1397 = vmatpush3.bf16.msra.mxu0 %v1518_v58 }
 0x197   : > { %v1320_v60 = vpop.f32.mrb[0].mxu0  ;;  %v1340_v61 = vpop.f32.mrb[0].mxu1 }
 0x198   : > { %v364_v62 = vpop.f32.mrb[1].mxu0  ;;  %v495_v63 = vpop.f32.mrb[1].mxu1  ;;  %v387_v3 = vrot.slane %v1320_v60, 7 }
 0x199   : > { %v384_v0 = vrot.slane %v364_v62, 7  ;;  %v1321_v1 = vpop.f32.mrb[2].mxu0  ;;  %v1341_v2 = vpop.f32.mrb[2].mxu1 }
 0x19a   : > { %v389_v4 = vrot.slane %v1321_v1, 7  ;;  %v367_v5 = vpop.f32.mrb[3].mxu0  ;;  %v498_v6 = vpop.f32.mrb[3].mxu1 }
 0x19b   : > { %v395_v7 = vsel %vm383_vm0, 0.0, %v384_v0  ;;  %v385_v8 = vrot.slane %v367_v5, 7 }
 0x19c   : > { %v510_v9 = vadd.f32 %v495_v63, %v395_v7  ;;  %v390_v10 = vsel %vm383_vm0, %v387_v3, %v389_v4 }
 0x19d   : > { %v513_v11 = vadd.f32 %v1341_v2, %v390_v10  ;;  %v388_v12 = vsel %vm383_vm0, %v385_v8, %v387_v3  ;;  %v386_v13 = vsel %vm383_vm0, %v384_v0, %v385_v8 }
 0x19e   : > { %v512_v14 = vadd.f32 %v1340_v61, %v388_v12  ;;  %v511_v15 = vadd.f32 %v498_v6, %v386_v13 }
 0x1b7   : > { %v1360_v16 = vpop.f32.mrb[4].mxu0 }
 0x1b8   : > { %v613_v17 = vpop.f32.mrb[5].mxu0  ;;  %v636_v19 = vrot.slane %v1360_v16, 1 }
 0x1b9   : > { %v1361_v18 = vpop.f32.mrb[6].mxu0  ;;  %v633_v24 = vrot.slane %v613_v17, 1 }
 0x1ba   : > { %v638_v20 = vrot.slane %v1361_v18, 1  ;;  %v616_v21 = vpop.f32.mrb[7].mxu0 }
 0x1bb   : > { %v634_v25 = vrot.slane %v616_v21, 1 }
 0x1bc   : > { %v639_v26 = vsel %vm632_vm1, %v636_v19, %v638_v20  ;;  %v644_v27 = vsel %vm632_vm1, %v638_v20, 0.0  ;;  %v1233_v20 = vld [vmem:[%s1848_s3 + $0x1] ss:$0 sm:$0xff] }
 0x1bd   : > { %v647_v31 = vadd.f32 %v639_v26, %v512_v14  ;;  %v648_v32 = vadd.f32 %v644_v27, %v513_v11  ;;  %v635_v33 = vsel %vm632_vm1, %v633_v24, %v634_v25  ;;  %v637_v34 = vsel %vm632_vm1, %v634_v25, %v636_v19 }
 0x1be   : > { %v645_v35 = vadd.f32 %v635_v33, %v510_v9  ;;  %v646_v36 = vadd.f32 %v637_v34, %v511_v15 }
 0x1bf   : > { %v658_v37 = vadd.f32 %v1207_v30, %v647_v31  ;;  %v659_v38 = vadd.f32 %v1207_v30, %v648_v32 }
 0x1c0   : > { %v656_v39 = vadd.f32 %v1207_v30, %v645_v35  ;;  %v657_v40 = vadd.f32 %v1207_v30, %v646_v36 }
 0x1c1   : > { %v662_v41 = vmax.f32 %v658_v37, 0.0  ;;  %v663_v42 = vmax.f32 %v659_v38, 0.0 }
 0x1c2   : > { %v660_v43 = vmax.f32 %v656_v39, 0.0  ;;  %v661_v44 = vmax.f32 %v657_v40, 0.0 }
 0x1c3   : > { %v667_v45 = vmul.f32 %v663_v42, %v1757_v28  ;;  %v666_v46 = vmul.f32 %v662_v41, %v1753_v22  ;;  %v1522_v28 = vld [vmem:[#allocation2 + $0x158] sm:$0xff]   ;;  %v1523_v22 = vld [vmem:[#allocation2 + $0x160] sm:$0xff]  }
 0x1c4   : > { %v664_v47 = vmul.f32 %v660_v43, %v1755_v23  ;;  %v665_v48 = vmul.f32 %v661_v44, %v1759_v29  ;;  %v1524_v23 = vld [vmem:[#allocation2 + $0x168] sm:$0xff]   ;;  %v1525_v29 = vld [vmem:[#allocation2 + $0x170] sm:$0xff]  }
 0x1c5   : > { %v669_v49 = vpack.c.bf16 %v667_v45, %v666_v46 }
 0x1c6   : > { %v668_v50 = vpack.c.bf16 %v665_v48, %v664_v47 }
 0x1c8   : > { %1378 = vmatprep.mubr.bf16.mxu1 %v668_v50  ;;  %1398 = vmatprep.mubr.bf16.mxu0 %v668_v50 }
 0x1c9   : > { %1379 = vmatmul.mubr.bf16.vlgmr.msra.gmra.mrb[4].mxu1 %v669_v49  ;;  %1399 = vmatmul.mubr.bf16.vlgmr.msra.gmra.mrb[8].mxu0 %v669_v49 }
 0x1ca   : > { %1403 = vmatpush3.bf16.msra.mxu1 %v1519_v59  ;;  %1418 = vmatprep.mubr.bf16.mxu1 %v668_v50 }
 0x1cb   : > { %1404 = vmatprep.subr.bf16.mxu1 %v1520_v51 }
 0x1ce   : > { %1405 = vmatpush3.bf16.msra.mxu1 %v1520_v51 }
 0x1cf   : > { %1406 = vmatprep.subr.bf16.mxu1 %v1521_v52 }
 0x1d2   : > { %1407 = vmatpush3.bf16.msra.mxu1 %v1521_v52 }
 0x1d3   : > { %1408 = vmatprep.subr.bf16.mxu1 %v1522_v28 }
 0x1d6   : > { %1409 = vmatpush3.bf16.msra.mxu1 %v1522_v28 }
 0x1d7   : > { %1410 = vmatprep.subr.bf16.mxu1 %v1523_v22 }
 0x1da   : > { %1411 = vmatpush3.bf16.msra.mxu1 %v1523_v22 }
 0x1db   : > { %1412 = vmatprep.subr.bf16.mxu1 %v1524_v23 }
 0x1de   : > { %1413 = vmatpush3.bf16.msra.mxu1 %v1524_v23 }
 0x1df   : > { %1414 = vmatprep.subr.bf16.mxu1 %v1525_v29 }
 0x1e2   : > { %1415 = vmatpush3.bf16.msra.mxu1 %v1525_v29 }
 0x1e3   : > { %1416 = vmatprep.subr.bf16.mxu1 %v1526_v53 }
 0x1e6   : > { %1417 = vmatpush3.bf16.msra.mxu1 %v1526_v53 }
 0x1e9   : > { %1419 = vmatmul.mubr.bf16.vlgmr.msra.gmra.mrb[8].mxu1 %v669_v49 }
 0x29c   : > { %v1380_v54 = vpop.f32.mrb[4].mxu1  ;;  %v1400_v55 = vpop.f32.mrb[8].mxu0 }
 0x29d   : > { %v769_v56 = vpop.f32.mrb[5].mxu1  ;;  %v899_v57 = vpop.f32.mrb[9].mxu0  ;;  %v791_v61 = vrot.slane %v1380_v54, 7 }
 0x29e   : > { %v788_v58 = vrot.slane %v769_v56, 7  ;;  %v1381_v59 = vpop.f32.mrb[6].mxu1  ;;  %v1401_v60 = vpop.f32.mrb[10].mxu0 }
 0x29f   : > { %v793_v62 = vrot.slane %v1381_v59, 7  ;;  %v772_v63 = vpop.f32.mrb[7].mxu1  ;;  %v902_v0 = vpop.f32.mrb[11].mxu0 }
 0x2a0   : > { %v799_v1 = vsel %vm383_vm0, 0.0, %v788_v58  ;;  %v789_v2 = vrot.slane %v772_v63, 7 }
 0x2a1   : > { %v914_v3 = vadd.f32 %v899_v57, %v799_v1  ;;  %v794_v4 = vsel %vm383_vm0, %v791_v61, %v793_v62 }
 0x2a2   : > { %v917_v5 = vadd.f32 %v1401_v60, %v794_v4  ;;  %v792_v6 = vsel %vm383_vm0, %v789_v2, %v791_v61  ;;  %v790_v7 = vsel %vm383_vm0, %v788_v58, %v789_v2 }
 0x2a3   : > { %v916_v8 = vadd.f32 %v1400_v55, %v792_v6  ;;  %v915_v9 = vadd.f32 %v902_v0, %v790_v7 }
 0x2bc   : > { %v1420_v10 = vpop.f32.mrb[8].mxu1 }
 0x2bd   : > { %v1017_v11 = vpop.f32.mrb[9].mxu1  ;;  %v1039_v13 = vrot.slane %v1420_v10, 1 }
 0x2be   : > { %v1421_v12 = vpop.f32.mrb[10].mxu1  ;;  %v1036_v16 = vrot.slane %v1017_v11, 1 }
 0x2bf   : > { %v1041_v14 = vrot.slane %v1421_v12, 1  ;;  %v1020_v15 = vpop.f32.mrb[11].mxu1 }
 0x2c0   : > { %v1037_v17 = vrot.slane %v1020_v15, 1 }
 0x2c1   : > { %v1042_v18 = vsel %vm632_vm1, %v1039_v13, %v1041_v14  ;;  %v1047_v19 = vsel %vm632_vm1, %v1041_v14, 0.0 }
 0x2c2   : > { %v1050_v21 = vadd.f32 %v1042_v18, %v916_v8  ;;  %v1051_v24 = vadd.f32 %v1047_v19, %v917_v5  ;;  %v1038_v25 = vsel %vm632_vm1, %v1036_v16, %v1037_v17  ;;  %v1040_v26 = vsel %vm632_vm1, %v1037_v17, %v1039_v13 }
 0x2c3   : > { %v1048_v27 = vadd.f32 %v1038_v25, %v914_v3  ;;  %v1049_v30 = vadd.f32 %v1040_v26, %v915_v9 }
 0x2c4   : > { %v1062_v31 = vadd.f32 %v1233_v20, %v1050_v21  ;;  %v1063_v32 = vadd.f32 %v1233_v20, %v1051_v24 }
 0x2c5   : > { %v1060_v33 = vadd.f32 %v1233_v20, %v1048_v27  ;;  %v1061_v34 = vadd.f32 %v1233_v20, %v1049_v30 }
 0x2c6   : > { %v1066_v35 = vmax.f32 %v1062_v31, 0.0  ;;  %v1067_v36 = vmax.f32 %v1063_v32, 0.0 }
 0x2c7   : > { %v1064_v37 = vmax.f32 %v1060_v33, 0.0  ;;  %v1065_v38 = vmax.f32 %v1061_v34, 0.0 }
 0x2c8   : > { %1070 = vst [vmem:[%s220_s14 + $0x10] sm:$0xff] %v1066_v35  ;;  %1071 = vst [vmem:[%s220_s14 + $0x18] sm:$0xff] %v1067_v36 }
 0x2c9   : > { %1068 = vst [vmem:[%s220_s14] sm:$0xff] %v1064_v37  ;;  %1069 = vst [vmem:[%s220_s14 + $0x8] sm:$0xff] %v1065_v38 }
 0x2ca   : > { %1568 = shalt.err (!%p1565_p7)
}
 0x2cb   : > { %s1569_s7 = scalar_lea.hbm %s1800_s27, 512  ;;  %s1573_s10 = scalar_lea.hbm %s1849_s4, 1024 }
 0x2cc   : > { %p1570_p8 = scmp.ne.s32.totalorder %s1800_s27, %s1569_s7  ;;  %p1574_p1 = scmp.lt.u32.totalorder %s1800_s27, %s1849_s4 }
 0x2cd   : > { %p1575_p0 = scmp.lt.u32.totalorder %s1573_s10, %s1569_s7  ;;  %p1577_p6 = scmp.lt.u32.totalorder %s1569_s7, %s1800_s27 }
 0x2ce   : > { %p1571_p11 = pnand %p1570_p8, %p1860_p9 }
 0x2cf   : > { %p1576_p5 = por %p1575_p0, %p1574_p1 }
 0x2d0   : > { %p1572_p13 = pneg %p1571_p11 }
 0x2d1   : > { %p1578_p10 = por %p1577_p6, %p1576_p5 }
 0x2d3   : > { %p1579_p12 = pnand %p1578_p10, %p1572_p13 }
 0x2d5   : > { %1582 = shalt.err (!%p1579_p12)
}
 0x2d6   : > { %s1628_s13 = smov 128   ;;  %s1629_s14 = smov 8  }
 0x2d7   : > { %1426 = dma.vmem_to_hbm [thread:$0]  (%p1860_p9), %s1795_s20, 512, %s1800_s27, %s1804_s19, %s1628_s13, %s1628_s13, %s1629_s14  }
 0x2d8 PF: > { %p1438_p2 = scmp.ge.s32.totalorder %s1621_s18, 2  ;;  %s1101_s22 = sand.u32 1, %s1609_s15  }
 0x2d9   : > { %p1861_p3 = scmp.ne.s32.totalorder %s1854_s26, 0  ;;  %s1102_s23 = scalar_lea.sflag [#allocation4], %s1101_s22 }
 0x2db   : > { %p1433_p4 = pnand %p1438_p2, %p1861_p3 }
 0x2dd   : > { %1604 = dma.done.wait (!%p1433_p4), %s1102_s23, 512  }
 0x2de   : > { %1606 = vsyncadd (!%p1433_p4), %s1102_s23, 4294966784  ;;  %p15_p7 = scmp.ge.s32.totalorder %s1680_s21, 4   ;;  %s1862_s15 = smov %s1613_s16 }
 0x2df   : > { %s1863_s16 = smov %s1617_s17  ;;  %s1864_s17 = smov %s1691_s24 }
 0x2e0   : > { %s1865_s18 = smov %s1680_s21  ;;  %17 = sbr.rel (!%p15_p7) target bundleno = 4 (0x4), region = 85 }
 0x2e7   :  { %1107 = vsyncpa [#allocation3], 1 }
 0x2e8   :  { %1109 = vsyncpa [#allocation3 + $0x1], 1 }
 0x2e9   :  { %1110 = vsyncpa [#allocation4], 1 }
 0x2ea   :  { %1112 = vsyncpa [#allocation4 + $0x1], 1 }

</bundles_post_ra>
